<compile_context>
chip_gen: v7x
topology: tpu7x:2x2x1
jax: 0.10.0
libtpu: 0.0.40
codegen_flags: <defaults>
</compile_context>

<pallas_src>
import jax
import jax.numpy as jnp
from jax.experimental import pallas as pl
from jax.experimental.pallas import tpu as pltpu

_LANE = 128   # vreg lane width (fast axis)
_SUB = 8      # sublane count used for row-tile granularity


def _round_up(x: int, m: int) -> int:
    return ((x + m - 1) // m) * m


def _cdiv(a: int, b: int) -> int:
    return (a + b - 1) // b


def _apply_time_mask_kernel(x_ref, keep_ref, masked_ref, unmasked_ref):
    """One row-tile: split x into (masked-steps-zeroed, complement)."""
    x = x_ref[...]                            # (C, R, 128)
    keep = keep_ref[...] != 0                 # (R, 128) bool, shared across channels
    masked = jnp.where(keep[None, :, :], x, jnp.zeros_like(x))
    masked_ref[...] = masked
    unmasked_ref[...] = x - masked            # exact complement (only masked steps kept)


def time_sequence_masking(audio_data, mask_rate, *, seed=0,
                          max_t_tile=32768,
                          vmem_budget_bytes=8 * 1024 * 1024):
    """Pallas implementation of TimeSequenceMaskingTransformer.forward.

    audio_data: (C, T) waveform (torchaudio.load convention).
    Returns (masked, unmasked), each (C, T), same dtype as input.
    """
    C, T = audio_data.shape
    dtype = audio_data.dtype
    itemsize = jnp.dtype(dtype).itemsize

    # Per-time-step Bernoulli mask, shared across channels.  Drawn in the
    # wrapper (deterministic in `seed`); True -> time-step is MASKED (zeroed
    # in `masked`).  keep == 1 - mask, carried as int8 to minimize bytes.
    key = jax.random.PRNGKey(seed)
    time_mask = jax.random.bernoulli(key, p=float(mask_rate), shape=(T,))
    keep = jnp.logical_not(time_mask).astype(jnp.int8)          # (T,) {0,1}

    # --- Sublane/lane-dense layout -----------------------------------------
    # Pad T to a multiple of 8*128 = 1024 so time reshapes into (rows, 128)
    # slabs with rows a multiple of 8; pad region is sliced off at the end.
    t_pad = _round_up(T, _SUB * _LANE)
    pad = t_pad - T
    x = jnp.pad(audio_data, ((0, 0), (0, pad))) if pad else audio_data
    keep_p = jnp.pad(keep, (0, pad)) if pad else keep

    rows = t_pad // _LANE
    x3 = x.reshape(C, rows, _LANE)
    keep2 = keep_p.reshape(rows, _LANE)

    # --- Tile sizing from an explicit VMEM budget ---------------------------
    # Double-buffered bytes per row of 128 samples:
    #   2 buffers x (3 audio blocks of C*128*itemsize + 128 bytes of int8 keep)
    bytes_per_row = 2 * (3 * C * _LANE * itemsize + _LANE)
    r_budget = max(_SUB, (vmem_budget_bytes // bytes_per_row) // _SUB * _SUB)
    r_cap = max(_SUB, (int(max_t_tile) // _LANE) // _SUB * _SUB)
    # Keep >= ~4 grid steps when possible so v7x's two TensorCores both work
    # ("parallel" is a no-op on single-TC v5e/v6e, harmless there).
    r_parallel = _round_up(_cdiv(rows, 4), _SUB)
    r_tile = max(_SUB, min(r_budget, r_cap, r_parallel, rows))

    grid = (_cdiv(rows, r_tile),)
    working_set = 2 * (3 * C * r_tile * _LANE * itemsize + r_tile * _LANE)

    cost = pl.CostEstimate(
        flops=2 * C * t_pad,                      # one select + one sub per sample
        transcendentals=0,
        bytes_accessed=3 * C * t_pad * itemsize + t_pad,
    )

    out_shapes = (
        jax.ShapeDtypeStruct((C, rows, _LANE), dtype),
        jax.ShapeDtypeStruct((C, rows, _LANE), dtype),
    )

    masked3, unmasked3 = pl.pallas_call(
        _apply_time_mask_kernel,
        grid=grid,
        in_specs=[
            pl.BlockSpec((C, r_tile, _LANE), lambda r: (0, r, 0)),   # audio tile
            pl.BlockSpec((r_tile, _LANE), lambda r: (r, 0)),         # int8 keep tile
        ],
        out_specs=(
            pl.BlockSpec((C, r_tile, _LANE), lambda r: (0, r, 0)),
            pl.BlockSpec((C, r_tile, _LANE), lambda r: (0, r, 0)),
        ),
        out_shape=out_shapes,
        compiler_params=pltpu.CompilerParams(
            # Independent tiles -> shard grid across TCs on v7x; neutral on
            # single-TC v5e/v6e.
            dimension_semantics=("parallel",),
            # Match the computed working set with generous headroom; stays
            # within every generation's physical VMEM (>= 64 MiB on v7x).
            vmem_limit_bytes=min(64 * 1024 * 1024,
                                 max(2 * working_set, 16 * 1024 * 1024)),
        ),
        cost_estimate=cost,
    )(x3, keep2)

    masked = masked3.reshape(C, t_pad)[:, :T]
    unmasked = unmasked3.reshape(C, t_pad)[:, :T]
    return masked, unmasked


if __name__ == "__main__":
    key = jax.random.PRNGKey(0)
    # Small waveform: 4 channels x 2048 samples.
    x = jax.random.normal(key, (4, 2048), dtype=jnp.float32)

    masked, unmasked = time_sequence_masking(x, mask_rate=0.1, seed=0)
    masked = jax.block_until_ready(masked)
    unmasked = jax.block_until_ready(unmasked)

    # Sanity: shapes match and the two outputs partition the input exactly.
    assert masked.shape == x.shape and unmasked.shape == x.shape
    assert jnp.allclose(masked + unmasked, x)
    # Disjoint support: a sample is non-zero in at most one of the outputs.
    assert jnp.all(masked * unmasked == 0.0)

    print("KERNEL_OK")
</pallas_src>

<mosaic_0001>
module attributes {stable_mosaic.version = 11 : i64} {
  func.func @_apply_time_mask_kernel(%arg0: i32, %arg1: memref<4x8x128xf32, #tpu.memory_space<vmem>>, %arg2: memref<8x128xi8, #tpu.memory_space<vmem>>, %arg3: memref<4x8x128xf32, #tpu.memory_space<vmem>>, %arg4: memref<4x8x128xf32, #tpu.memory_space<vmem>>) attributes {dimension_semantics = [#tpu.dimension_semantics<parallel>], iteration_bounds = array<i64: 2>, scalar_prefetch = 0 : i64, scratch_operands = 0 : i64, tpu.core_type = #tpu.core_type<tc>, window_params = [{transform_indices = @transform_0, window_bounds = array<i64: 4, 8, 128>}, {transform_indices = @transform_1, window_bounds = array<i64: 8, 128>}, {transform_indices = @transform_2, window_bounds = array<i64: 4, 8, 128>}, {transform_indices = @transform_3, window_bounds = array<i64: 4, 8, 128>}]} {
    %c0 = arith.constant 0 : index
    %c0_0 = arith.constant 0 : index
    %c0_1 = arith.constant 0 : index
    %0 = vector.load %arg1[%c0, %c0_0, %c0_1] : memref<4x8x128xf32, #tpu.memory_space<vmem>>, vector<4x8x128xf32>
    %c0_2 = arith.constant 0 : index
    %c0_3 = arith.constant 0 : index
    %1 = vector.load %arg2[%c0_2, %c0_3] : memref<8x128xi8, #tpu.memory_space<vmem>>, vector<8x128xi8>
    %c0_i8 = arith.constant 0 : i8
    %2 = vector.broadcast %c0_i8 : i8 to vector<8x128xi8>
    %3 = arith.cmpi ne, %1, %2 : vector<8x128xi8>
    %4 = vector.shape_cast %3 : vector<8x128xi1> to vector<1x8x128xi1>
    %cst = arith.constant 0.000000e+00 : f32
    %5 = vector.broadcast %cst : f32 to vector<4x8x128xf32>
    %6 = vector.shape_cast %4 : vector<1x8x128xi1> to vector<1x8x128xi1>
    %7 = vector.broadcast %6 : vector<1x8x128xi1> to vector<4x8x128xi1>
    %8 = arith.select %7, %0, %5 : vector<4x8x128xi1>, vector<4x8x128xf32>
    %c0_4 = arith.constant 0 : index
    %c0_5 = arith.constant 0 : index
    %c0_6 = arith.constant 0 : index
    %9 = vector.load %arg3[%c0_4, %c0_5, %c0_6] : memref<4x8x128xf32, #tpu.memory_space<vmem>>, vector<4x8x128xf32>
    tpu.vector_store %arg3[%c0_4, %c0_5, %c0_6], %8 {strides = array<i32>} : memref<4x8x128xf32, #tpu.memory_space<vmem>>, vector<4x8x128xf32>,
    %10 = arith.subf %0, %8 : vector<4x8x128xf32>
    %c0_7 = arith.constant 0 : index
    %c0_8 = arith.constant 0 : index
    %c0_9 = arith.constant 0 : index
    %11 = vector.load %arg4[%c0_7, %c0_8, %c0_9] : memref<4x8x128xf32, #tpu.memory_space<vmem>>, vector<4x8x128xf32>
    tpu.vector_store %arg4[%c0_7, %c0_8, %c0_9], %10 {strides = array<i32>} : memref<4x8x128xf32, #tpu.memory_space<vmem>>, vector<4x8x128xf32>,
    return
  }
  func.func @transform_0(%arg0: i32) -> (i32, i32, i32) {
    %c0_i32 = arith.constant 0 : i32
    %c0_i32_0 = arith.constant 0 : i32
    %c0_i32_1 = arith.constant 0 : i32
    return %c0_i32, %arg0, %c0_i32_0 : i32, i32, i32
  }
  func.func @transform_1(%arg0: i32) -> (i32, i32) {
    %c0_i32 = arith.constant 0 : i32
    %c0_i32_0 = arith.constant 0 : i32
    return %arg0, %c0_i32 : i32, i32
  }
  func.func @transform_2(%arg0: i32) -> (i32, i32, i32) {
    %c0_i32 = arith.constant 0 : i32
    %c0_i32_0 = arith.constant 0 : i32
    %c0_i32_1 = arith.constant 0 : i32
    return %c0_i32, %arg0, %c0_i32_0 : i32, i32, i32
  }
  func.func @transform_3(%arg0: i32) -> (i32, i32, i32) {
    %c0_i32 = arith.constant 0 : i32
    %c0_i32_0 = arith.constant 0 : i32
    %c0_i32_1 = arith.constant 0 : i32
    return %c0_i32, %arg0, %c0_i32_0 : i32, i32, i32
  }
}

</mosaic_0001>

<bundles_post_ra>
// kernel: tpu_custom_call.1
= control target key start
LH: loop header
LB: loop body
LE: loop exit
PB: predicated region body
PF: predicated region fallthrough
CT: control target
= control target key end

     0   :  { %9 = vsyncpa [#allocation3], 0  ;;  %s952_s0 = inlined_call_operand.hbm [shape: f32[4,16,128], index: 0, kind: input, shape index: {}]   ;;  %s953_s1 = inlined_call_operand.hbm [shape: s8[16,128], index: 1, kind: input, shape index: {}]   ;;  %s954_s2 = inlined_call_operand.hbm [shape: f32[4,16,128], index: 2, kind: output, shape index: {0}]   ;;  %s955_s3 = inlined_call_operand.hbm [shape: f32[4,16,128], index: 3, kind: output, shape index: {1}]  }
   0x1   :  { %11 = vsyncpa [#allocation3 + $0x1], 0 }
   0x2   :  { %12 = vsyncpa [#allocation6], 0 }
   0x3   :  { %14 = vsyncpa [#allocation6 + $0x1], 0 }
   0x4   :  { %15 = vsyncpa [#allocation4], 0 }
   0x5   :  { %17 = vsyncpa [#allocation4 + $0x1], 0 }
   0x6   :  { %18 = vsyncpa [#allocation9], 0 }
   0x7   :  { %20 = vsyncpa [#allocation9 + $0x1], 0  ;;  %s702_s12 = smov 0   ;;  %s704_s13 = smov 0  }
   0x8   :  { %s706_s14 = smov 0   ;;  %s708_s15 = smov 0  }
   0x9 LB: > { %s723_s16 = sadd.s32 4294967295, %s669_s15   ;;  %s426_s17 = sadd.s32 4294967294, %s669_s15   ;;  %s669_s15 = sphi %s708_s15, %s973_s15   ;;  %s665_s14 = sphi %s706_s14, %s972_s14   ;;  %s661_s13 = sphi %s704_s13, %s971_s13   ;;  %s657_s12 = sphi %s702_s12, %s970_s12  }
   0xa   : > { %s727_s18 = sadd.s32 1, %s669_s15   ;;  %s33_s19 = sadd.s32 1, %s665_s14 }
   0xb   : > { %s30_s20 = ssub.s32 %s669_s15, %s727_s18  ;;  %p40_p0 = scmp.ne.s32.totalorder %s665_s14, %s661_s13 }
   0xc   : > { %p31_p1 = scmp.eq.s32.totalorder %s30_s20, 0  ;;  %p41_p2 = scmp.eq.s32.totalorder %s669_s15, 0 }
   0xd   : > { %p46_p3 = scmp.ne.s32.totalorder %s661_s13, %s657_s12  ;;  %p47_p4 = scmp.eq.s32.totalorder %s723_s16, 0 }
   0xe   : > { %s739_s21 = scalar_select %p31_p1, %s665_s14, %s33_s19  }
   0xf   : > { %p741_p5 = por %p41_p2, %p40_p0  ;;  %p745_p6 = por %p47_p4, %p46_p3 }
  0x10   : > { %p96_p7 = scmp.eq.s32.totalorder %s723_s16, 1  ;;  %p102_p8 = scmp.eq.s32.totalorder %s426_s17, 1 }
  0x11   : > { %s959_s23 = scalar_select %p745_p6, 1, 0 }
  0x12   : > { %p466_p10 = scmp.lt.s32.totalorder %s669_s15, 2  ;;  %p752_p11 = por %p96_p7, %p40_p0 }
  0x13   : > { %p756_p12 = por %p102_p8, %p46_p3  ;;  %s761_s26 = sand.u32 1, %s665_s14  }
  0x14   : > { %s960_s24 = scalar_select %p752_p11, 1, 0 }
  0x15   : > { %s961_s25 = scalar_select %p756_p12, 1, 0 }
  0x16   : > { %s430_s27 = sshll.u32 %s669_s15, 7  ;;  %s429_s28 = sshll.u32 %s761_s26, 5 }
  0x17   : > { %s768_s4 = scalar_lea.hbm %s952_s0, %s430_s27  ;;  %s152_s5 = scalar_lea.vmem [#allocation2], %s429_s28 }
  0x18   : > { %s158_s6 = sshll.u32 %s152_s5, 4  ;;  %p772_p13 = pnand %p466_p10, %p741_p5  ;;  %s776_s6 = int_to_ptr.vmem [resolvable:$true] %s158_s6 }
  0x19   : > { %s149_s8 = scalar_lea.sflag [#allocation3], %s761_s26  ;;  %s507_s9 = scalar_lea.hbm %s768_s4, 512 }
  0x1a   : > { %p508_p1 = scmp.ne.s32.totalorder %s768_s4, %s507_s9  ;;  %p509_p2 = pneg %p772_p13 }
  0x1b   : > { %s512_s17 = scalar_lea.hbm %s952_s0, 1024  ;;  %p513_p5 = scmp.lt.u32.totalorder %s768_s4, %s952_s0 }
  0x1c   : > { %p510_p3 = pnand %p509_p2, %p508_p1  ;;  %p514_p7 = scmp.lt.u32.totalorder %s512_s17, %s507_s9 }
  0x1d   : > { %p516_p10 = scmp.lt.u32.totalorder %s507_s9, %s768_s4 }
  0x1e   : > { %p511_p4 = pneg %p510_p3  ;;  %p515_p8 = por %p514_p7, %p513_p5 }
  0x20   : > { %p517_p9 = por %p516_p10, %p515_p8 }
  0x22   : > { %p518_p0 = pnand %p517_p9, %p511_p4 }
  0x24   : > { %521 = shalt.err (!%p518_p0)
}
  0x25   : > { %s522_s22 = scalar_lea.vmem %s776_s6, 512  ;;  %s671_s27 = smov [#allocation2]  }
  0x26   : > { %p523_p1 = scmp.ne.s32.totalorder %s776_s6, %s522_s22  ;;  %s527_s28 = sshll.u32 %s671_s27, 4  ;;  %s528_s28 = int_to_ptr.vmem [resolvable:$false] %s527_s28 }
  0x27   : > { %s529_s29 = scalar_lea.vmem %s528_s28, 1024  ;;  %p530_p11 = scmp.lt.s32.totalorder %s776_s6, %s528_s28 }
  0x28   : > { %p525_p3 = pnand %p523_p1, %p509_p2  ;;  %p531_p5 = scmp.lt.s32.totalorder %s529_s29, %s522_s22 }
  0x2a   : > { %p526_p12 = pneg %p525_p3  ;;  %p532_p7 = por %p531_p5, %p530_p11 }
  0x2c   : > { %p533_p8 = pnand %p532_p7, %p526_p12 }
  0x2e   : > { %536 = shalt.err (!%p533_p8)
}
  0x2f   : > { %s672_s30 = smov 256   ;;  %s673_s5 = smov 128  }
  0x30   : > { %s674_s9 = smov 8   ;;  %p184_p9 = scmp.lt.s32.totalorder %s669_s15, 3 }
  0x31   : > { %455 = dma.hbm_to_vmem [thread:$0]  (!%p772_p13), %s768_s4, 512, %s776_s6, %s149_s8, %s672_s30, %s673_s5, %s674_s9  }
  0x32   : > { %s431_s10 = sshll.u32 %s761_s26, 1  ;;  %s432_s11 = sshll.u32 %s669_s15, 5 }
  0x33   : > { %p963_p11 = scmp.ge.s32.totalorder %s669_s15, 1  ;;  %s819_s22 = scalar_lea.hbm %s953_s1, %s432_s11 }
  0x34   : > { %s172_s27 = scalar_lea.vmem [#allocation5], %s431_s10  ;;  %s169_s4 = scalar_lea.sflag [#allocation6], %s761_s26 }
  0x35   : > { %p812_p12 = pnand %p963_p11, %p184_p9  ;;  %s179_s28 = sshll.u32 %s172_s27, 4  ;;  %s180_s28 = int_to_ptr.vmem [resolvable:$true] %s179_s28 }
  0x36   : > { %s537_s6 = scalar_lea.hbm %s819_s22, 32  ;;  %s542_s30 = scalar_lea.hbm %s953_s1, 64 }
  0x37   : > { %s964_s17 = scalar_select %p812_p12, 1, 0 }
  0x38   : > { %p538_p0 = scmp.ne.s32.totalorder %s819_s22, %s537_s6  ;;  %p543_p1 = scmp.lt.u32.totalorder %s819_s22, %s953_s1 }
  0x39   : > { %p544_p3 = scmp.lt.u32.totalorder %s542_s30, %s537_s6  ;;  %p546_p7 = scmp.lt.u32.totalorder %s537_s6, %s819_s22 }
  0x3a   : > { %p540_p4 = pnand %p538_p0, %p509_p2 }
  0x3b   : > { %p545_p5 = por %p544_p3, %p543_p1 }
  0x3c   : > { %p541_p10 = pneg %p540_p4 }
  0x3d   : > { %p547_p8 = por %p546_p7, %p545_p5 }
  0x3f   : > { %p548_p9 = pnand %p547_p8, %p541_p10 }
  0x41   : > { %551 = shalt.err (!%p548_p9)
}
  0x42   : > { %s552_s26 = scalar_lea.vmem %s180_s28, 32  ;;  %s675_s10 = smov [#allocation5]  }
  0x43   : > { %p553_p11 = scmp.ne.s32.totalorder %s180_s28, %s552_s26  ;;  %s557_s11 = sshll.u32 %s675_s10, 4  ;;  %s558_s11 = int_to_ptr.vmem [resolvable:$false] %s557_s11 }
  0x44   : > { %s559_s19 = scalar_lea.vmem %s558_s11, 64  ;;  %p560_p6 = scmp.lt.s32.totalorder %s180_s28, %s558_s11 }
  0x45   : > { %p555_p0 = pnand %p553_p11, %p509_p2  ;;  %p561_p12 = scmp.lt.s32.totalorder %s559_s19, %s552_s26 }
  0x47   : > { %p556_p4 = pneg %p555_p0  ;;  %p562_p1 = por %p561_p12, %p560_p6 }
  0x49   : > { %p563_p3 = pnand %p562_p1, %p556_p4 }
  0x4b   : > { %566 = shalt.err (!%p563_p3)
}
  0x4c   : > { %458 = dma.hbm_to_vmem [thread:$0]  (!%p772_p13), %s819_s22, 32, %s180_s28, %s169_s4  }
  0x4d   : > { %p965_p10 = scmp.ne.s32.totalorder %s964_s17, 0 }
  0x4e   : > { %s844_s20 = sand.u32 (!%p965_p10), 1, %s661_s13   ;;  %p966_p2 = scmp.ne.s32.totalorder (!%p965_p10), %s959_s23, 0 }
  0x4f   : > { %188 = sbr.rel (%p965_p10) target bundleno = 141 (0x8d), region = 28  ;;  %s434_s27 = sshll.u32 (!%p965_p10), %s844_s20, 5 }
  0x50   : > { %s191_s6 = scalar_lea.sflag (!%p965_p10), [#allocation3], %s844_s20  ;;  %s194_s8 = scalar_lea.vmem (!%p965_p10), [#allocation2], %s434_s27 }
  0x56   : > { %640 = dma.done.wait (%p966_p2), %s191_s6, 512  }
  0x57   : > { %642 = vsyncadd (%p966_p2), %s191_s6, 4294966784  ;;  %s435_s7 = sshll.u32 %s844_s20, 1  ;;  %s200_s17 = scalar_lea.sflag [#allocation6], %s844_s20 }
  0x58   : > { %s203_s22 = scalar_lea.vmem [#allocation5], %s435_s7 }
  0x59   : > { %644 = dma.done.wait (%p966_p2), %s200_s17, 32  }
  0x5a   : > { %646 = vsyncadd (%p966_p2), %s200_s17, 4294967264  ;;  %v242_v0 = vld [vmem:[%s203_s22] sm:$0x3]  ;;  %s228_s28 = scalar_lea.vmem [#allocation7], %s434_s27  ;;  %s440_s29 = sshll.u32 %s723_s16, 7  ;;  %v676_v2 = vmov 0  }
  0x5b   : > { %s283_s4 = sshll.u32 %s228_s28, 4  ;;  %vm243_vm0 = vnez %v242_v0  ;;  %v238_v1 = vld [vmem:[%s194_s8] sm:$0xff]  ;;  %s859_s30 = scalar_lea.vmem [#allocation8], %s434_s27  ;;  %v239_v5 = vld [vmem:[%s194_s8 + $0x8] sm:$0xff]  ;;  %v240_v6 = vld [vmem:[%s194_s8 + $0x10] sm:$0xff]  ;;  %s862_s4 = int_to_ptr.vmem [resolvable:$true] %s283_s4 }
  0x5c   : > { %v244_v3 = vsel %vm243_vm0, 16843009, %v676_v2  ;;  %s298_s5 = sshll.u32 %s859_s30, 4  ;;  %v241_v7 = vld [vmem:[%s194_s8 + $0x18] sm:$0xff]  ;;  %s867_s26 = scalar_lea.hbm %s954_s2, %s440_s29  ;;  %s869_s5 = int_to_ptr.vmem [resolvable:$true] %s298_s5 }
  0x5d   : > { %v245_v4 = vunpack.c.0.s8 %v244_v3  ;;  %s874_s11 = scalar_lea.hbm %s955_s3, %s440_s29  ;;  %s266_s19 = scalar_lea.sflag [#allocation4], %s844_s20 }
  0x5e   : > { %s567_s27 = scalar_lea.vmem %s862_s4, 512  ;;  %p967_p13 = scmp.ne.s32.totalorder %s960_s24, 0 }
  0x5f   : > { %vm246_vm1 = vcmp.ne.s32.totalorder %v245_v4, 0  ;;  %p568_p6 = scmp.ne.s32.totalorder %s862_s4, %s567_s27  ;;  %s677_s6 = smov [#allocation7]  }
  0x60   : > { %v249_v8 = vsel %vm246_vm1, %v238_v1, 0.0  ;;  %v250_v9 = vsel %vm246_vm1, %v239_v5, 0.0  ;;  %v251_v10 = vsel %vm246_vm1, %v240_v6, 0.0  ;;  %v252_v11 = vsel %vm246_vm1, %v241_v7, 0.0  ;;  %s571_s8 = sshll.u32 %s677_s6, 4  ;;  %s572_s8 = int_to_ptr.vmem [resolvable:$false] %s571_s8 }
  0x61   : > { %253 = vst [vmem:[%s228_s28] sm:$0xff] %v249_v8  ;;  %v257_v12 = vsub.f32 %v238_v1, %v249_v8  ;;  %254 = vst [vmem:[%s228_s28 + $0x8] sm:$0xff] %v250_v9  ;;  %v258_v13 = vsub.f32 %v239_v5, %v250_v9  ;;  %v259_v14 = vsub.f32 %v240_v6, %v251_v10  ;;  %p569_p12 = pnand %p568_p6, %p967_p13  ;;  %s573_s7 = scalar_lea.vmem %s572_s8, 1024 }
  0x62   : > { %255 = vst [vmem:[%s228_s28 + $0x10] sm:$0xff] %v251_v10  ;;  %256 = vst [vmem:[%s228_s28 + $0x18] sm:$0xff] %v252_v11  ;;  %v260_v15 = vsub.f32 %v241_v7, %v252_v11  ;;  %p574_p7 = scmp.lt.s32.totalorder %s862_s4, %s572_s8  ;;  %p575_p8 = scmp.lt.s32.totalorder %s573_s7, %s567_s27 }
  0x63   : > { %p570_p5 = pneg %p569_p12 }
  0x64   : > { %p576_p9 = por %p575_p8, %p574_p7 }
  0x66   : > { %p577_p11 = pnand %p576_p9, %p570_p5 }
  0x68   : > { %580 = shalt.err (!%p577_p11)
}
  0x69   : > { %s581_s17 = scalar_lea.hbm %s867_s26, 512  ;;  %s585_s29 = scalar_lea.hbm %s954_s2, 1024 }
  0x6a   : > { %p582_p0 = scmp.ne.s32.totalorder %s867_s26, %s581_s17  ;;  %p586_p3 = scmp.lt.u32.totalorder %s867_s26, %s954_s2 }
  0x6b   : > { %p587_p10 = scmp.lt.u32.totalorder %s585_s29, %s581_s17  ;;  %p589_p6 = scmp.lt.u32.totalorder %s581_s17, %s867_s26 }
  0x6c   : > { %p583_p4 = pnand %p582_p0, %p967_p13 }
  0x6d   : > { %p588_p2 = por %p587_p10, %p586_p3 }
  0x6e   : > { %p584_p1 = pneg %p583_p4 }
  0x6f   : > { %p590_p12 = por %p589_p6, %p588_p2 }
  0x71   : > { %p591_p5 = pnand %p590_p12, %p584_p1 }
  0x73   : > { %594 = shalt.err (!%p591_p5)
}
  0x74   : > { %s678_s16 = smov 128   ;;  %s679_s10 = smov 256   ;;  %261 = vst [vmem:[%s859_s30] sm:$0xff] %v257_v12  ;;  %262 = vst [vmem:[%s859_s30 + $0x8] sm:$0xff] %v258_v13 }
  0x75   : > { %s680_s27 = smov 8   ;;  %263 = vst [vmem:[%s859_s30 + $0x10] sm:$0xff] %v259_v14  ;;  %264 = vst [vmem:[%s859_s30 + $0x18] sm:$0xff] %v260_v15  ;;  %s271_s6 = scalar_lea.sflag [#allocation9], %s844_s20 }
  0x76   : > { %448 = dma.vmem_to_hbm [thread:$0]  (%p967_p13), %s862_s4, 512, %s867_s26, %s266_s19, %s678_s16, %s679_s10, %s680_s27  }
  0x77   : > { %s595_s8 = scalar_lea.vmem %s869_s5, 512  ;;  %s681_s7 = smov [#allocation8]  }
  0x78   : > { %p596_p7 = scmp.ne.s32.totalorder %s869_s5, %s595_s8  ;;  %s599_s17 = sshll.u32 %s681_s7, 4  ;;  %s600_s17 = int_to_ptr.vmem [resolvable:$false] %s599_s17 }
  0x79   : > { %s601_s22 = scalar_lea.vmem %s600_s17, 1024  ;;  %p602_p11 = scmp.lt.s32.totalorder %s869_s5, %s600_s17 }
  0x7a   : > { %p597_p8 = pnand %p596_p7, %p967_p13  ;;  %p603_p0 = scmp.lt.s32.totalorder %s601_s22, %s595_s8 }
  0x7c   : > { %p598_p9 = pneg %p597_p8  ;;  %p604_p4 = por %p603_p0, %p602_p11 }
  0x7e   : > { %p605_p1 = pnand %p604_p4, %p598_p9 }
  0x80   : > { %608 = shalt.err (!%p605_p1)
}
  0x81   : > { %s609_s4 = scalar_lea.hbm %s874_s11, 512  ;;  %s613_s19 = scalar_lea.hbm %s955_s3, 1024 }
  0x82   : > { %p610_p3 = scmp.ne.s32.totalorder %s874_s11, %s609_s4  ;;  %p614_p6 = scmp.lt.u32.totalorder %s874_s11, %s955_s3 }
  0x83   : > { %p615_p12 = scmp.lt.u32.totalorder %s613_s19, %s609_s4  ;;  %p617_p7 = scmp.lt.u32.totalorder %s609_s4, %s874_s11 }
  0x84   : > { %p611_p10 = pnand %p610_p3, %p967_p13 }
  0x85   : > { %p616_p5 = por %p615_p12, %p614_p6 }
  0x86   : > { %p612_p2 = pneg %p611_p10 }
  0x87   : > { %p618_p8 = por %p617_p7, %p616_p5 }
  0x89   : > { %p619_p9 = pnand %p618_p8, %p612_p2 }
  0x8b   : > { %622 = shalt.err (!%p619_p9)
}
  0x8c   : > { %449 = dma.vmem_to_hbm [thread:$0]  (%p967_p13), %s869_s5, 512, %s874_s11, %s271_s6, %s678_s16, %s679_s10, %s680_s27  }
  0x8d PF: > { %s313_s23 = sand.u32 1, %s657_s12   ;;  %p968_p11 = scmp.ne.s32.totalorder %s961_s25, 0 }
  0x8e   : > { %p969_p0 = scmp.ge.s32.totalorder %s669_s15, 2  ;;  %s314_s9 = scalar_lea.sflag [#allocation4], %s313_s23 }
  0x90   : > { %p460_p4 = pnand %p969_p0, %p968_p11 }
  0x92   : > { %648 = dma.done.wait (!%p460_p4), %s314_s9, 512  }
  0x93   : > { %650 = vsyncadd (!%p460_p4), %s314_s9, 4294966784  ;;  %s323_s24 = scalar_lea.sflag [#allocation9], %s313_s23 }
  0x94   : > { %652 = dma.done.wait (!%p460_p4), %s323_s24, 512  }
  0x95   : > { %654 = vsyncadd (!%p460_p4), %s323_s24, 4294966784  ;;  %p23_p13 = scmp.ge.s32.totalorder %s727_s18, 4   ;;  %s970_s12 = smov %s661_s13 }
  0x96   : > { %s971_s13 = smov %s665_s14  ;;  %s972_s14 = smov %s739_s21 }
  0x97   : > { %s973_s15 = smov %s727_s18  ;;  %25 = sbr.rel (!%p23_p13) target bundleno = 9 (0x9), region = 103 }
  0x9e   :  { %328 = vsyncpa [#allocation3], 1 }
  0x9f   :  { %330 = vsyncpa [#allocation3 + $0x1], 1 }
  0xa0   :  { %331 = vsyncpa [#allocation6], 1 }
  0xa1   :  { %333 = vsyncpa [#allocation6 + $0x1], 1 }
  0xa2   :  { %334 = vsyncpa [#allocation4], 1 }
  0xa3   :  { %336 = vsyncpa [#allocation4 + $0x1], 1 }
  0xa4   :  { %337 = vsyncpa [#allocation9], 1 }
  0xa5   :  { %339 = vsyncpa [#allocation9 + $0x1], 1 }

</bundles_post_ra>
